<compile_context>
chip_gen: v5e
topology: v5e:2x2
jax: 0.10.0
libtpu: 0.0.40
codegen_flags: <defaults>
</compile_context>

<pallas_src>
import numpy as np
import jax
import jax.numpy as jnp
from jax.experimental import pallas as pl
from jax.experimental.pallas import tpu as pltpu


def _nearest_embed_kernel(x_ref, emb_ref, neg2_emb_t_ref, e_sq_ref, q_ref, idx_ref):
    """One (batch, column-tile) grid step.

    x_ref          : (1, D, TILE_N)  input columns for this batch element
    emb_ref        : (D, K)          codebook (resident)
    neg2_emb_t_ref : (K, D)          -2 * codebook^T (resident)
    e_sq_ref       : (K, 1)          per-code squared norms ||e_k||^2 (resident, f32)
    q_ref          : (1, D, TILE_N)  quantized output
    idx_ref        : (1, 1, TILE_N)  argmin per column (int32)
    """
    x = x_ref[0]                          # (D, TILE_N), native dtype; MXU accumulates f32
    neg2_emb_t = neg2_emb_t_ref[...]      # (K, D)
    k = neg2_emb_t.shape[0]
    tn = x.shape[1]

    # ||x - e||^2 = ||x||^2 - 2 x.e + ||e||^2 ; ||x||^2 is constant per column so the
    # argmin of (||e||^2 - 2 x.e) is identical.  The -2 is pre-folded into neg2_emb_t.
    scores = jnp.dot(neg2_emb_t, x, preferred_element_type=jnp.float32)   # (K, TN) = -2 x.e
    dist = e_sq_ref[...] + scores                                         # (K, TN) f32

    # First-occurrence argmin over the K (sublane) axis via two min-reductions (XLU).
    min_val = jnp.min(dist, axis=0, keepdims=True)                        # (1, TN)
    iota_ki = jax.lax.broadcasted_iota(jnp.int32, (k, tn), 0)             # (K, TN)
    masked_idx = jnp.where(dist <= min_val, iota_ki.astype(jnp.float32), float(k))
    argmin_f = jnp.min(masked_idx, axis=0, keepdims=True)                 # (1, TN)
    argmin_i = argmin_f.astype(jnp.int32)                                 # (1, TN)

    # Gather nearest codes with a one-hot matmul (stays on the MXU; exact copies of the
    # codebook entries since onehot is exactly 0/1 and accumulation is f32).
    onehot = (iota_ki == argmin_i).astype(emb_ref.dtype)                  # (K, TN)
    quantized = jnp.dot(emb_ref[...], onehot,
                        preferred_element_type=jnp.float32)               # (D, TN)

    q_ref[0] = quantized.astype(q_ref.dtype)
    idx_ref[0] = argmin_i


def _choose_tile_n(s_cols, batch, d, k, itemsize, vmem_budget_bytes=28 * 1024 * 1024):
    """Largest lane tile (multiple of 128, not exceeding padded S) whose padded working
    set fits the VMEM budget; then shrink so the parallel grid has >= 2 steps when there
    is enough work, keeping both TensorCores busy on v7x."""
    d_pad = -(-d // 8) * 8
    k_pad = -(-k // 8) * 8
    s_pad128 = -(-s_cols // 128) * 128
    tile_n = 128
    for tn in (32768, 16384, 8192, 4096, 2048, 1024, 512, 256, 128):
        if tn > s_pad128:
            continue
        vmem = (
            2 * (2 * d_pad * tn + tn) * max(itemsize, 4)      # double-buffered x in, q out, idx out
            + 2 * (2 * d_pad * k_pad + k_pad * 128) * 4       # resident emb / -2*emb^T / e_sq (padded)
            + 6 * k_pad * tn * 4                              # scores/dist/onehot intermediates
        )
        if vmem <= vmem_budget_bytes:
            tile_n = tn
            break
    # Keep at least 2 grid steps when possible (megacore sharding of the parallel grid).
    while tile_n > 128 and batch * (-(-s_cols // tile_n)) < 2:
        tile_n //= 2
    return tile_n


def nearest_embed_pallas(x, emb, *, tile_n=None):
    """x: (B, D, *spatial), emb: (D, K).  Returns (quantized, argmin)."""
    B = x.shape[0]
    D = x.shape[1]
    spatial = x.shape[2:]
    K = emb.shape[1]
    assert emb.shape[0] == D, "input.size(1) must equal weight.size(0)"

    S = int(np.prod(spatial)) if len(spatial) else 1
    itemsize = jnp.dtype(x.dtype).itemsize

    if tile_n is None:
        tile_n = _choose_tile_n(S, B, D, K, itemsize)
    assert tile_n % 128 == 0, "tile_n must be a multiple of 128"

    # Free reshape: collapse trailing spatial dims onto the lane axis; no HBM transpose.
    x3 = x.reshape(B, D, S)
    S_pad = int(pl.cdiv(S, tile_n)) * tile_n
    if S_pad != S:
        x3 = jnp.pad(x3, ((0, 0), (0, 0), (0, S_pad - S)))

    # Hoisted codebook prep (resident in VMEM across the whole grid).
    neg2_emb_t = -2.0 * emb.T                                            # (K, D)
    e_sq = jnp.sum(emb.astype(jnp.float32) ** 2, axis=0).reshape(K, 1)   # (K, 1)

    cost = pl.CostEstimate(
        flops=2 * 2 * B * S_pad * D * K,                      # distance + gather matmuls
        transcendentals=0,
        bytes_accessed=2 * B * S_pad * D * itemsize + 4 * B * S_pad + 2 * D * K * 4,
    )

    q3, idx3 = pl.pallas_call(
        _nearest_embed_kernel,
        out_shape=(
            jax.ShapeDtypeStruct((B, D, S_pad), x.dtype),
            jax.ShapeDtypeStruct((B, 1, S_pad), jnp.int32),
        ),
        grid_spec=pltpu.PrefetchScalarGridSpec(
            num_scalar_prefetch=0,
            grid=(B, S_pad // tile_n),
            in_specs=[
                pl.BlockSpec((1, D, tile_n), lambda b, i: (b, 0, i)),   # x columns
                pl.BlockSpec((D, K), lambda b, i: (0, 0)),              # codebook (resident)
                pl.BlockSpec((K, D), lambda b, i: (0, 0)),              # -2*codebook^T (resident)
                pl.BlockSpec((K, 1), lambda b, i: (0, 0)),              # ||e||^2 (resident)
            ],
            out_specs=[
                pl.BlockSpec((1, D, tile_n), lambda b, i: (b, 0, i)),   # quantized (lane-dense)
                pl.BlockSpec((1, 1, tile_n), lambda b, i: (b, 0, i)),   # argmin (lane-dense)
            ],
        ),
        compiler_params=pltpu.CompilerParams(
            dimension_semantics=("parallel", "parallel"),
            vmem_limit_bytes=32 * 1024 * 1024,   # safe on v5e/v6e (128 MiB) and v7x (64 MiB)
        ),
        cost_estimate=cost,
    )(x3, emb, neg2_emb_t, e_sq)

    q3 = q3[:, :, :S]
    idx = idx3[:, 0, :S]

    quantized = q3.reshape((B, D) + spatial)     # free reshape back to (B, D, *spatial)
    argmin = idx.reshape((B,) + spatial)         # (B, *spatial)
    return quantized, argmin


def nearest_embed_reference(x, emb):
    """Pure-JAX reference mirroring the PyTorch forward (training=False)."""
    x_expanded = x[..., None]                                    # (B, D, *sp, 1)
    num_arb = x.ndim - 2
    emb_expanded = emb.reshape((emb.shape[0],) + (1,) * num_arb + (emb.shape[1],))
    dist = jnp.linalg.norm(x_expanded - emb_expanded, ord=2, axis=1)   # (B, *sp, K)
    argmin = jnp.argmin(dist, axis=-1)                           # (B, *sp)
    result = emb.T[argmin]                                       # (B, *sp, D)
    result = jnp.moveaxis(result, -1, 1)                         # (B, D, *sp)
    return result, argmin


if __name__ == "__main__":
    key = jax.random.PRNGKey(0)
    k_x, k_w = jax.random.split(key)

    # Module config: NearestEmbedEMA(n_emb=8, emb_dim=4)
    n_emb = 8
    emb_dim = 4
    B, H, W = 2, 16, 16

    x = jax.random.normal(k_x, (B, emb_dim, H, W), dtype=jnp.float32)
    # buffer: torch.rand(emb_dim, n_emb) -> uniform [0, 1)
    weight = jax.random.uniform(k_w, (emb_dim, n_emb), dtype=jnp.float32)

    quantized, argmin = nearest_embed_pallas(x, weight)
    quantized = jax.block_until_ready(quantized)
    argmin = jax.block_until_ready(argmin)

    q_ref, a_ref = nearest_embed_reference(x, weight)
    assert quantized.shape == (B, emb_dim, H, W)
    assert argmin.shape == (B, H, W)
    np.testing.assert_array_equal(np.asarray(argmin), np.asarray(a_ref))
    np.testing.assert_allclose(np.asarray(quantized), np.asarray(q_ref), rtol=1e-5, atol=1e-5)

    print("KERNEL_OK")
</pallas_src>

<mosaic_0001>
module attributes {stable_mosaic.version = 11 : i64} {
  func.func @_nearest_embed_kernel(%arg0: i32, %arg1: i32, %arg2: memref<1x4x256xf32, #tpu.memory_space<vmem>>, %arg3: memref<4x8xf32, #tpu.memory_space<vmem>>, %arg4: memref<8x4xf32, #tpu.memory_space<vmem>>, %arg5: memref<8x1xf32, #tpu.memory_space<vmem>>, %arg6: memref<1x4x256xf32, #tpu.memory_space<vmem>>, %arg7: memref<1x1x256xi32, #tpu.memory_space<vmem>>) attributes {dimension_semantics = [#tpu.dimension_semantics<parallel>, #tpu.dimension_semantics<parallel>], iteration_bounds = array<i64: 2, 1>, scalar_prefetch = 0 : i64, scratch_operands = 0 : i64, tpu.core_type = #tpu.core_type<tc>, window_params = [{transform_indices = @transform_0, window_bounds = array<i64: 1, 4, 256>}, {pipeline_mode = #tpu.pipeline_mode<synchronous>, transform_indices = @transform_1, window_bounds = array<i64: 4, 8>}, {pipeline_mode = #tpu.pipeline_mode<synchronous>, transform_indices = @transform_2, window_bounds = array<i64: 8, 4>}, {pipeline_mode = #tpu.pipeline_mode<synchronous>, transform_indices = @transform_3, window_bounds = array<i64: 8, 1>}, {transform_indices = @transform_4, window_bounds = array<i64: 1, 4, 256>}, {transform_indices = @transform_5, window_bounds = array<i64: 1, 1, 256>}]} {
    %c0 = arith.constant 0 : index
    %c0_0 = arith.constant 0 : index
    %c0_1 = arith.constant 0 : index
    %0 = vector.load %arg2[%c0, %c0_0, %c0_1] : memref<1x4x256xf32, #tpu.memory_space<vmem>>, vector<1x4x256xf32>
    %1 = vector.shape_cast %0 : vector<1x4x256xf32> to vector<4x256xf32>
    %c0_2 = arith.constant 0 : index
    %c0_3 = arith.constant 0 : index
    %2 = vector.load %arg4[%c0_2, %c0_3] : memref<8x4xf32, #tpu.memory_space<vmem>>, vector<8x4xf32>
    %cst = arith.constant dense<0.000000e+00> : vector<8x256xf32>
    %3 = tpu.matmul %2, %1, %cst {dimension_numbers = #tpu.dot_dimension_numbers<[1], [0], [0], [1], [0, 0, 1, 1], [], []>} : vector<8x4xf32>, vector<4x256xf32>, vector<8x256xf32> -> vector<8x256xf32>
    %c0_4 = arith.constant 0 : index
    %c0_5 = arith.constant 0 : index
    %4 = vector.load %arg5[%c0_4, %c0_5] : memref<8x1xf32, #tpu.memory_space<vmem>>, vector<8x1xf32>
    %5 = vector.broadcast %4 : vector<8x1xf32> to vector<8x256xf32>
    %6 = arith.addf %5, %3 : vector<8x256xf32>
    %cst_6 = arith.constant dense<0x7F800000> : vector<256xf32>
    %7 = vector.multi_reduction <minimumf>, %6, %cst_6 [0] : vector<8x256xf32> to vector<256xf32>
    %8 = vector.shape_cast %7 : vector<256xf32> to vector<1x256xf32>
    %9 = tpu.iota {dimensions = array<i32: 0>} : vector<8x256xi32>
    %10 = vector.broadcast %8 : vector<1x256xf32> to vector<8x256xf32>
    %11 = arith.cmpf ole, %6, %10 : vector<8x256xf32>
    %12 = arith.sitofp %9 : vector<8x256xi32> to vector<8x256xf32>
    %cst_7 = arith.constant 8.000000e+00 : f32
    %13 = vector.broadcast %cst_7 : f32 to vector<8x256xf32>
    %14 = arith.select %11, %12, %13 : vector<8x256xi1>, vector<8x256xf32>
    %cst_8 = arith.constant dense<0x7F800000> : vector<256xf32>
    %15 = vector.multi_reduction <minimumf>, %14, %cst_8 [0] : vector<8x256xf32> to vector<256xf32>
    %16 = vector.shape_cast %15 : vector<256xf32> to vector<1x256xf32>
    %17 = arith.fptosi %16 : vector<1x256xf32> to vector<1x256xi32>
    %18 = vector.broadcast %17 : vector<1x256xi32> to vector<8x256xi32>
    %19 = arith.cmpi eq, %9, %18 : vector<8x256xi32>
    %20 = arith.extui %19 : vector<8x256xi1> to vector<8x256xi32>
    %21 = arith.sitofp %20 : vector<8x256xi32> to vector<8x256xf32>
    %c0_9 = arith.constant 0 : index
    %c0_10 = arith.constant 0 : index
    %22 = vector.load %arg3[%c0_9, %c0_10] : memref<4x8xf32, #tpu.memory_space<vmem>>, vector<4x8xf32>
    %cst_11 = arith.constant dense<0.000000e+00> : vector<4x256xf32>
    %23 = tpu.matmul %22, %21, %cst_11 {dimension_numbers = #tpu.dot_dimension_numbers<[1], [0], [0], [1], [0, 0, 1, 1], [], []>} : vector<4x8xf32>, vector<8x256xf32>, vector<4x256xf32> -> vector<4x256xf32>
    %c0_12 = arith.constant 0 : index
    %c0_13 = arith.constant 0 : index
    %c0_14 = arith.constant 0 : index
    %24 = vector.load %arg6[%c0_12, %c0_13, %c0_14] : memref<1x4x256xf32, #tpu.memory_space<vmem>>, vector<1x4x256xf32>
    %25 = vector.shape_cast %24 : vector<1x4x256xf32> to vector<4x256xf32>
    %26 = vector.shape_cast %23 : vector<4x256xf32> to vector<1x4x256xf32>
    tpu.vector_store %arg6[%c0_12, %c0_13, %c0_14], %26 {strides = array<i32>} : memref<1x4x256xf32, #tpu.memory_space<vmem>>, vector<1x4x256xf32>,
    %c0_15 = arith.constant 0 : index
    %c0_16 = arith.constant 0 : index
    %c0_17 = arith.constant 0 : index
    %27 = vector.load %arg7[%c0_15, %c0_16, %c0_17] : memref<1x1x256xi32, #tpu.memory_space<vmem>>, vector<1x1x256xi32>
    %28 = vector.shape_cast %27 : vector<1x1x256xi32> to vector<1x256xi32>
    %29 = vector.shape_cast %17 : vector<1x256xi32> to vector<1x1x256xi32>
    tpu.vector_store %arg7[%c0_15, %c0_16, %c0_17], %29 {strides = array<i32>} : memref<1x1x256xi32, #tpu.memory_space<vmem>>, vector<1x1x256xi32>,
    return
  }
  func.func @transform_0(%arg0: i32, %arg1: i32) -> (i32, i32, i32) {
    %c0_i32 = arith.constant 0 : i32
    %c0_i32_0 = arith.constant 0 : i32
    return %arg0, %c0_i32, %arg1 : i32, i32, i32
  }
  func.func @transform_1(%arg0: i32, %arg1: i32) -> (i32, i32) {
    %c0_i32 = arith.constant 0 : i32
    %c0_i32_0 = arith.constant 0 : i32
    %c0_i32_1 = arith.constant 0 : i32
    return %c0_i32, %c0_i32_0 : i32, i32
  }
  func.func @transform_2(%arg0: i32, %arg1: i32) -> (i32, i32) {
    %c0_i32 = arith.constant 0 : i32
    %c0_i32_0 = arith.constant 0 : i32
    %c0_i32_1 = arith.constant 0 : i32
    return %c0_i32, %c0_i32_0 : i32, i32
  }
  func.func @transform_3(%arg0: i32, %arg1: i32) -> (i32, i32) {
    %c0_i32 = arith.constant 0 : i32
    %c0_i32_0 = arith.constant 0 : i32
    %c0_i32_1 = arith.constant 0 : i32
    return %c0_i32, %c0_i32_0 : i32, i32
  }
  func.func @transform_4(%arg0: i32, %arg1: i32) -> (i32, i32, i32) {
    %c0_i32 = arith.constant 0 : i32
    %c0_i32_0 = arith.constant 0 : i32
    return %arg0, %c0_i32, %arg1 : i32, i32, i32
  }
  func.func @transform_5(%arg0: i32, %arg1: i32) -> (i32, i32, i32) {
    %c0_i32 = arith.constant 0 : i32
    %c0_i32_0 = arith.constant 0 : i32
    return %arg0, %c0_i32, %arg1 : i32, i32, i32
  }
}

</mosaic_0001>

<bundles_post_ra>
// kernel: tpu_custom_call.1
= control target key start
LH: loop header
LB: loop body
LE: loop exit
PB: predicated region body
PF: predicated region fallthrough
CT: control target
= control target key end

     0   :  { %11 = vsyncpa [#allocation3], 0  ;;  %s954_s0 = inlined_call_operand.vmem [shape: f32[2,4,256], index: 0, kind: input, shape index: {}]   ;;  %s955_s1 = inlined_call_operand.vmem [shape: f32[4,8], index: 1, kind: input, shape index: {}]   ;;  %s956_s2 = inlined_call_operand.vmem [shape: f32[8,4], index: 2, kind: input, shape index: {}]   ;;  %s957_s3 = inlined_call_operand.vmem [shape: f32[8,1], index: 3, kind: input, shape index: {}]   ;;  %s958_s4 = inlined_call_operand.hbm [shape: f32[2,4,256], index: 4, kind: output, shape index: {0}]   ;;  %s959_s5 = inlined_call_operand.hbm [shape: s32[2,1,256], index: 5, kind: output, shape index: {1}]  }
   0x1   :  { %13 = vsyncpa [#allocation3 + $0x1], 0 }
   0x2   :  { %14 = vsyncpa [#allocation5], 0 }
   0x3   :  { %16 = vsyncpa [#allocation5 + $0x1], 0  ;;  %s825_s18 = smov 0   ;;  %s827_s19 = smov 0  }
   0x4   :  { %s829_s20 = smov 0   ;;  %s831_s21 = smov 0  }
   0x5   :  { %s833_s22 = smov 0   ;;  %s835_s23 = smov 0  }
   0x6 LB: > { %s580_s24 = sadd.s32 4294967295, %s791_s23   ;;  %s581_s25 = sadd.s32 4294967294, %s791_s23   ;;  %s791_s23 = sphi %s835_s23, %s22_s23   ;;  %s787_s22 = sphi %s833_s22, %s966_s22   ;;  %s783_s21 = sphi %s831_s21, %s965_s21   ;;  %s779_s20 = sphi %s829_s20, %s964_s20   ;;  %s775_s19 = sphi %s827_s19, %s963_s19   ;;  %s771_s18 = sphi %s825_s18, %s962_s18  }
   0x7   : > { %s34_s26 = sadd.s32 1, %s787_s22  ;;  %s134_s27 = sadd.s32 1, %s779_s20 }
   0x8   : > { %p36_p0 = scmp.ge.s32.totalorder %s34_s26, 2  ;;  %p144_p1 = scmp.ne.s32.totalorder %s779_s20, %s775_s19 }
   0x9   : > { %p145_p2 = scmp.eq.s32.totalorder %s580_s24, 1  ;;  %p150_p3 = scmp.ne.s32.totalorder %s775_s19, %s771_s18 }
   0xa   : > { %s968_s26 = smov (%p36_p0, %s34_s26), 0  ;;  %p151_p5 = scmp.eq.s32.totalorder %s581_s25, 1 }
   0xb   : > { %p865_p4 = por %p145_p2, %p144_p1  ;;  %s129_s29 = ssub.s32 %s787_s22, %s968_s26 }
   0xc   : > { %p584_p6 = scmp.ge.s32.totalorder %s791_s23, 1  ;;  %p132_p7 = scmp.eq.s32.totalorder %s129_s29, 0 }
   0xd   : > { %p872_p8 = por %p151_p5, %p150_p3  ;;  %p219_p9 = scmp.lt.s32.totalorder %s791_s23, 3 }
   0xe   : > { %s878_s6 = scalar_select %p132_p7, %s779_s20, %s134_s27  }
   0xf   : > { %p220_p10 = pnand %p584_p6, %p219_p9 }
  0x10   : > { %p257_p11 = scmp.lt.s32.totalorder (!%p220_p10), %s783_s21, 1  ;;  %s894_s16 = sand.u32 (!%p220_p10), 1, %s775_s19  }
  0x11   : > { %223 = sbr.rel (%p220_p10) target bundleno = 336 (0x150), region = 36  ;;  %s586_s17 = sshll.u32 (!%p220_p10), %s894_s16, 1 }
  0x12   : > { %s255_s27 = scalar_lea.vmem (!%p220_p10), [#allocation4], %s586_s17  ;;  %s603_s29 = sshll.u32 (!%p220_p10), %s783_s21, 1 }
  0x13   : > { %s466_s7 = sshll.u32 (!%p220_p10), %s255_s27, 4  ;;  %s435_s12 = scalar_lea.sflag (!%p220_p10), [#allocation5], %s894_s16  ;;  %s467_s7 = int_to_ptr.vmem [resolvable:$true] %s466_s7 }
  0x14   : > { %s701_s24 = scalar_lea.hbm (!%p220_p10), %s959_s5, 4 }
  0x16   : > { %v323_v0 = vld [vmem:[%s957_s3] sm:$0xff]  ;;  %v793_v1 = vmov 0   ;;  %s258_s9 = scalar_select %p257_p11, %s783_s21, 1  ;;  %vm278_vm0 = vcmask 1043456   ;;  %vm274_vm1 = vcmask 31744   ;;  %v343_v13 = vlaneseq }
  0x17   : > { %680 = vset.pattern.permute.xlu0 %v793_v1  ;;  %v269_v3 = vld [vmem:[%s956_s2] sm:$0xff]  ;;  %vm371_vm7 = vcmask 64512   ;;  %vm422_vm8 = vcmask 1040384   ;;  %v794_v49 = vmov 1.0  }
  0x18   : > { %326 = vperm.xlu0 %680, %v323_v0   ;;  %s606_s10 = sshll.u32 %s258_s9, 3  ;;  %v344_v18 = vshrl.u32 %v343_v13, 7  ;;  %v370_v48 = vld [vmem:[%s955_s1] sm:$0xf]  ;;  %vm426_vm10 = vcmp.lt.s32.totalorder %v343_v13, 256 }
  0x19   : > { %s264_s13 = scalar_lea.vmem %s954_s0, %s606_s10  ;;  %s464_s10 = scalar_lea.hbm %s959_s5, %s603_s29 }
  0x1a   : > { %v268_v2 = vld [vmem:[%s264_s13] sm:$0xff]  ;;  %v347_v23 = vcvt.s32.f32 %v344_v18  ;;  %s468_s11 = sshll.u32 %s464_s10, 4  ;;  %s469_s11 = int_to_ptr.hbm [resolvable:$true] %s468_s11 }
  0x1b   : > { %271 = vst [vmem:[#allocation1] ss:$2 sm:$0xff] %v268_v2  ;;  %s695_s13 = sshra.s32 %s469_s11, 4  ;;  %s696_s13 = int_to_ptr.hbm [resolvable:$true] %s695_s13 }
  0x1c   : > { %s697_s14 = scalar_lea.hbm %s696_s13, 2  ;;  %p702_p1 = scmp.lt.s32.totalorder %s696_s13, %s959_s5 }
  0x1d   : > { %p698_p12 = scmp.ne.s32.totalorder %s696_s13, %s697_s14  ;;  %p703_p2 = scmp.lt.s32.totalorder %s701_s24, %s697_s14 }
  0x1f   : > { %p699_p13 = pnand %p698_p12, %p865_p4  ;;  %p704_p3 = por %p703_p2, %p702_p1 }
  0x21   : > { %p700_p0 = pneg %p699_p13 }
  0x22   : > { %v272_v4 = vld.sshfl [vmem:[#allocation1] sm:$0xff pattern:$0x75316420]  ;;  %v273_v5 = vld.sshfl [vmem:[#allocation1 + $0x8] sm:$0xff pattern:$0x75316420] }
  0x23   : > { %589 = vmatpush.msk.msra.mxu0 %vm278_vm0, %v272_v4  ;;  %591 = vmatpush.msk.msra.mxu1 %vm278_vm0, %v273_v5  ;;  %p705_p5 = pnand %p704_p3, %p700_p0 }
  0x24   : > { %590 = vmatmul.msk.f32.vlgmr.msra.gmra.mxu0 %vm274_vm1, %v269_v3  ;;  %592 = vmatmul.msk.f32.vlgmr.msra.gmra.mxu1 %vm274_vm1, %v269_v3 }
  0x8a   : > { %v327_v6 = vpop.permute.xlu0 %326 }
  0xa1   : > { %v300_v7 = vpop.f32.mrf.mxu0  ;;  %v320_v8 = vpop.f32.mrf.mxu1 }
  0xa2   : > { %v329_v9 = vadd.f32 %v327_v6, %v300_v7  ;;  %v330_v10 = vadd.f32 %v327_v6, %v320_v8 }
  0xa4   : > { %v331_v11 = vrot.slane %v329_v9, 4  ;;  %v337_v12 = vrot.slane %v330_v10, 4 }
  0xa6   : > { %v332_v14 = vmin.f32 %v329_v9, %v331_v11  ;;  %v338_v15 = vmin.f32 %v330_v10, %v337_v12 }
  0xa8   : > { %v333_v16 = vrot.slane %v332_v14, 2  ;;  %v339_v17 = vrot.slane %v338_v15, 2 }
  0xaa   : > { %v334_v19 = vmin.f32 %v332_v14, %v333_v16  ;;  %v340_v20 = vmin.f32 %v338_v15, %v339_v17 }
  0xac   : > { %v335_v21 = vrot.slane %v334_v19, 1  ;;  %v341_v22 = vrot.slane %v340_v20, 1 }
  0xae   : > { %v336_v24 = vmin.f32 %v334_v19, %v335_v21  ;;  %v342_v25 = vmin.f32 %v340_v20, %v341_v22 }
  0xb0   : > { %vm345_vm2 = vcmp.le.f32.partialorder %v329_v9, %v336_v24  ;;  %vm346_vm3 = vcmp.le.f32.partialorder %v330_v10, %v342_v25 }
  0xb1   : > { %v348_v26 = vsel %vm345_vm2, %v347_v23, 8.0  ;;  %v349_v27 = vsel %vm346_vm3, %v347_v23, 8.0 }
  0xb2   : > { %v350_v28 = vrot.slane %v348_v26, 4  ;;  %v356_v29 = vrot.slane %v349_v27, 4 }
  0xb4   : > { %v351_v30 = vmin.f32 %v348_v26, %v350_v28  ;;  %v357_v31 = vmin.f32 %v349_v27, %v356_v29 }
  0xb6   : > { %v352_v32 = vrot.slane %v351_v30, 2  ;;  %v358_v33 = vrot.slane %v357_v31, 2 }
  0xb8   : > { %v353_v34 = vmin.f32 %v351_v30, %v352_v32  ;;  %v359_v35 = vmin.f32 %v357_v31, %v358_v33 }
  0xba   : > { %v354_v36 = vrot.slane %v353_v34, 1  ;;  %v360_v37 = vrot.slane %v359_v35, 1 }
  0xbc   : > { %v355_v38 = vmin.f32 %v353_v34, %v354_v36  ;;  %v361_v39 = vmin.f32 %v359_v35, %v360_v37 }
  0xbe   : > { %vm608_vm4 = vcmp.lt.s32.totalorder %v355_v38, 0  ;;  %v609_v40 = vceil.f32 %v355_v38  ;;  %v610_v41 = vfloor.f32 %v355_v38  ;;  %vm613_vm5 = vcmp.lt.s32.totalorder %v361_v39, 0 }
  0xbf   : > { %v614_v42 = vceil.f32 %v361_v39  ;;  %v615_v43 = vfloor.f32 %v361_v39 }
  0xc0   : > { %v611_v44 = vsel %vm608_vm4, %v609_v40, %v610_v41 }
  0xc1   : > { %v612_v45 = vcvt.f32.s32 %v611_v44  ;;  %v616_v46 = vsel %vm613_vm5, %v614_v42, %v615_v43 }
  0xc2   : > { %v617_v47 = vcvt.f32.s32 %v616_v46 }
  0xc3   : > { %vm364_vm6 = vcmp.eq.s32.totalorder %v344_v18, %v612_v45 }
  0xc4   : > { %595 = vmatpush.msk.msra.mxu2 %vm364_vm6, %v794_v49  ;;  %vm365_vm9 = vcmp.eq.s32.totalorder %v344_v18, %v617_v47  ;;  %v421_v50 = vrot.slane %v617_v47, 7 }
  0xc5   : > { %597 = vmatpush.msk.msra.mxu3 %vm365_vm9, %v794_v49  ;;  %596 = vmatmul.msk.f32.vlgmr.msra.gmra.mxu2 %vm371_vm7, %v370_v48 }
  0xc6   : > { %598 = vmatmul.msk.f32.vlgmr.msra.gmra.mxu3 %vm371_vm7, %v370_v48  ;;  %v423_v51 = vsel %vm422_vm8, %v612_v45, %v421_v50 }
  0xc7   : > { %428 = vst.msk [vmem:[%s255_s27] sm:$0x3] %vm426_vm10, %v423_v51 }
  0xc8   : > { %708 = shalt.err (!%p705_p5)
}
  0xc9   : > { %619 = dma.vmem_to_hbm [thread:$0]  (%p865_p4), %s467_s7, 32, %s469_s11, %s435_s12  }
  0xca   : > { %s585_s29 = sshll.u32 %s894_s16, 3  ;;  %s607_s8 = sshll.u32 %s783_s21, 3 }
  0xcb   : > { %s448_s15 = scalar_lea.hbm %s958_s4, %s607_s8  ;;  %s248_s17 = scalar_lea.vmem [#allocation2], %s585_s29 }
  0xcc   : > { %s450_s25 = sshll.u32 %s248_s17, 4  ;;  %s452_s13 = sshll.u32 %s448_s15, 4  ;;  %s451_s25 = int_to_ptr.vmem [resolvable:$true] %s450_s25  ;;  %s453_s13 = int_to_ptr.hbm [resolvable:$true] %s452_s13 }
  0xcd   : > { %s430_s14 = scalar_lea.sflag [#allocation3], %s894_s16  ;;  %s723_s7 = sshra.s32 %s453_s13, 4  ;;  %s724_s7 = int_to_ptr.hbm [resolvable:$true] %s723_s7 }
  0xce   : > { %s725_s21 = scalar_lea.hbm %s724_s7, 8  ;;  %s729_s24 = scalar_lea.hbm %s958_s4, 16 }
  0xcf   : > { %p726_p6 = scmp.ne.s32.totalorder %s724_s7, %s725_s21  ;;  %p730_p10 = scmp.lt.s32.totalorder %s724_s7, %s958_s4 }
  0xd0   : > { %p731_p11 = scmp.lt.s32.totalorder %s729_s24, %s725_s21 }
  0xd1   : > { %p727_p7 = pnand %p726_p6, %p865_p4 }
  0xd2   : > { %p732_p12 = por %p731_p11, %p730_p10 }
  0xd3   : > { %p728_p9 = pneg %p727_p7 }
  0xd5   : > { %p733_p13 = pnand %p732_p12, %p728_p9 }
 0x148   : > { %v392_v53 = vpop.f32.mrf.mxu2 }
 0x149   : > { %v412_v52 = vpop.f32.mrf.mxu3 }
 0x14a   : > { %v417_v54 = vrot.slane %v412_v52, 4 }
 0x14c   : > { %v418_v55 = vsel %vm278_vm0, %v392_v53, %v417_v54 }
 0x14d   : > { %420 = vst [vmem:[%s248_s17] sm:$0xff] %v418_v55 }
 0x14e   : > { %736 = shalt.err (!%p733_p13)
}
 0x14f   : > { %618 = dma.vmem_to_hbm [thread:$0]  (%p865_p4), %s451_s25, 128, %s453_s13, %s430_s14  }
 0x150 PF: > { %p629_p0 = scmp.ge.s32.totalorder %s791_s23, 2  ;;  %s480_s16 = sand.u32 1, %s771_s18  }
 0x151   : > { %s481_s8 = scalar_lea.sflag [#allocation3], %s480_s16 }
 0x152   : > { %p623_p1 = pnand %p629_p0, %p872_p8 }
 0x154   : > { %p624_p2 = pneg %p623_p1 }
 0x156   : > { %762 = dma.done.wait (%p624_p2), %s481_s8, 128  }
 0x157   : > { %764 = vsyncadd (%p624_p2), %s481_s8, 4294967168  ;;  %s491_s9 = scalar_lea.sflag [#allocation5], %s480_s16 }
 0x158   : > { %766 = dma.done.wait (%p624_p2), %s491_s9, 32  }
 0x159   : > { %768 = vsyncadd (%p624_p2), %s491_s9, 4294967264  ;;  %s22_s23 = sadd.s32 1, %s791_s23   ;;  %s962_s18 = smov %s775_s19 }
 0x15a   : > { %p19_p3 = scmp.ge.s32.totalorder %s22_s23, 4   ;;  %s963_s19 = smov %s779_s20 }
 0x15b   : > { %s964_s20 = smov %s878_s6  ;;  %s965_s21 = smov %s787_s22 }
 0x15c   : > { %s966_s22 = smov %s968_s26  ;;  %21 = sbr.rel (!%p19_p3) target bundleno = 6 (0x6), region = 88 }
 0x161   :  { %497 = vsyncpa [#allocation3], 1 }
 0x162   :  { %499 = vsyncpa [#allocation3 + $0x1], 1 }
 0x163   :  { %500 = vsyncpa [#allocation5], 1 }
 0x164   :  { %502 = vsyncpa [#allocation5 + $0x1], 1 }

</bundles_post_ra>
